<compile_context>
chip_gen: v5e
topology: v5e:2x2
jax: 0.10.0
libtpu: 0.0.40
codegen_flags: <defaults>
</compile_context>

<pallas_src>
import functools

import jax
import jax.numpy as jnp
from jax.experimental import pallas as pl
from jax.experimental.pallas import tpu as pltpu


def mnist_mlp_kernel(x_ref, w1_ref, b1_ref, w2_ref, b2_ref, o_ref):
    # fc1 + ReLU: bf16 operands, f32 MXU accumulation; bias/activation in f32.
    # Padded hidden columns have zero weights/bias -> stay exactly zero.
    h = jnp.dot(x_ref[...], w1_ref[...], preferred_element_type=jnp.float32) + b1_ref[...]
    h = jnp.maximum(h, 0.0)

    # fc2: cast h to bf16 for a native single-pass MXU matmul. Padded w2 rows
    # are zero; padded output columns carry bias = -1e30 so they vanish below.
    logits = jnp.dot(h.astype(jnp.bfloat16), w2_ref[...],
                     preferred_element_type=jnp.float32) + b2_ref[...]

    # Numerically-stable log_softmax over the 128 lanes: padded columns
    # contribute exp(-huge) == 0 to the sum and never win the max.
    m = jnp.max(logits, axis=-1, keepdims=True)
    shifted = logits - m
    lse = jnp.log(jnp.sum(jnp.exp(shifted), axis=-1, keepdims=True))
    o_ref[...] = (shifted - lse).astype(o_ref.dtype)


def _default_tile_and_vmem():
    """Pick (batch_tile, vmem_limit_bytes) from the TPU generation's VMEM size."""
    try:
        vmem_bytes = int(pltpu.get_tpu_info().vmem_capacity_bytes)
    except Exception:
        vmem_bytes = 64 * 1024 * 1024  # conservative (v7x-sized) fallback
    if vmem_bytes >= 100 * 1024 * 1024:          # v5e / v6e: 128 MiB physical
        return 4096, 96 * 1024 * 1024
    return 2048, 48 * 1024 * 1024                # v7x: 64 MiB physical per TC


@functools.partial(jax.jit, static_argnames=("tb", "vmem_limit"))
def _mnist_forward_impl(x, w1, b1, w2, b2, *, tb, vmem_limit):
    B, Din = x.shape
    H = w1.shape[1]          # 100
    Nout = w2.shape[1]       # 10
    HP = 128                 # padded hidden (lane-dense MXU K)
    NP = 128                 # padded logits (lane-dense stores)
    NEG = jnp.float32(-1e30)

    # --- pad + cast parameters once (tiny; never per grid step) --------------
    w1p = (jnp.zeros((Din, HP), jnp.float32)
           .at[:, :H].set(w1.astype(jnp.float32)).astype(jnp.bfloat16))
    b1p = jnp.zeros((1, HP), jnp.float32).at[:, :H].set(b1.astype(jnp.float32))
    w2p = (jnp.zeros((HP, NP), jnp.float32)
           .at[:H, :Nout].set(w2.astype(jnp.float32)).astype(jnp.bfloat16))
    b2p = jnp.full((1, NP), NEG, jnp.float32).at[:, :Nout].set(b2.astype(jnp.float32))

    xb = x.astype(jnp.bfloat16)      # halves the dominant HBM stream; no jnp.pad

    # --- batch tile: bf16-friendly multiple of 16, or the whole batch --------
    TB = min(int(tb), B)
    if TB < B:
        TB = max(16, (TB // 16) * 16)
        TB = min(TB, B)
    grid = (pl.cdiv(B, TB),)         # partial last block handled by Pallas

    cost = pl.CostEstimate(
        flops=2 * B * Din * HP + 2 * B * HP * NP,
        transcendentals=B * (NP + 1),                       # exp per lane + log per row
        bytes_accessed=(B * Din * 2 + B * NP * 2            # bf16 x in, bf16 out
                        + (Din * HP + HP * NP) * 2          # bf16 weights
                        + (HP + NP) * 4),                   # f32 biases
    )

    out = pl.pallas_call(
        mnist_mlp_kernel,
        out_shape=jax.ShapeDtypeStruct((B, NP), jnp.bfloat16),
        grid_spec=pltpu.PrefetchScalarGridSpec(
            num_scalar_prefetch=0,
            grid=grid,
            in_specs=[
                pl.BlockSpec((TB, Din), lambda i: (i, 0)),   # streamed x tile
                pl.BlockSpec((Din, HP), lambda i: (0, 0)),   # resident weights
                pl.BlockSpec((1, HP), lambda i: (0, 0)),
                pl.BlockSpec((HP, NP), lambda i: (0, 0)),
                pl.BlockSpec((1, NP), lambda i: (0, 0)),
            ],
            out_specs=pl.BlockSpec((TB, NP), lambda i: (i, 0)),
        ),
        compiler_params=pltpu.CompilerParams(
            dimension_semantics=("parallel",),               # megacore split on v7x
            vmem_limit_bytes=vmem_limit,
        ),
        cost_estimate=cost,
    )(xb, w1p, b1p, w2p, b2p)

    # Return the real 10 classes in f32 (tiny slice + cast).
    return out[:, :Nout].astype(jnp.float32)


def mnist_net_forward(x, w1, b1, w2, b2, *, tb=None):
    """x: [B, 784]; w1: [784,100]; b1: [100]; w2: [100,10]; b2: [10] -> [B,10] f32."""
    default_tb, vmem_limit = _default_tile_and_vmem()
    if tb is None:
        tb = default_tb
    return _mnist_forward_impl(x, w1, b1, w2, b2, tb=int(tb), vmem_limit=int(vmem_limit))


def init_params(key):
    """Parameters matching the PyTorch module (fc1 xavier_uniform, default bias init).
    Stored pre-transposed as [in, out] so the kernel computes x @ W + b."""
    k1, k2, k3, k4 = jax.random.split(key, 4)
    fan_in1, fan_out1 = 784, 100
    bound1 = (6.0 / (fan_in1 + fan_out1)) ** 0.5            # xavier_uniform (gain=1)
    w1 = jax.random.uniform(k1, (fan_in1, fan_out1), jnp.float32, -bound1, bound1)
    bb1 = 1.0 / (fan_in1 ** 0.5)
    b1 = jax.random.uniform(k2, (fan_out1,), jnp.float32, -bb1, bb1)
    fan_in2, fan_out2 = 100, 10
    bb2 = 1.0 / (fan_in2 ** 0.5)
    w2 = jax.random.uniform(k3, (fan_in2, fan_out2), jnp.float32, -bb2, bb2)
    b2 = jax.random.uniform(k4, (fan_out2,), jnp.float32, -bb2, bb2)
    return w1, b1, w2, b2


def reference_forward_f32(x, w1, b1, w2, b2):
    h = jnp.maximum(x @ w1 + b1, 0.0)
    logits = h @ w2 + b2
    return jax.nn.log_softmax(logits, axis=1)


def reference_forward_bf16(x, w1, b1, w2, b2):
    # Same bf16 recipe as the kernel (bf16 operands, f32 accumulation, bf16 out).
    h = jnp.dot(x.astype(jnp.bfloat16), w1.astype(jnp.bfloat16),
                preferred_element_type=jnp.float32) + b1
    h = jnp.maximum(h, 0.0)
    logits = jnp.dot(h.astype(jnp.bfloat16), w2.astype(jnp.bfloat16),
                     preferred_element_type=jnp.float32) + b2
    out = jax.nn.log_softmax(logits, axis=1)
    return out.astype(jnp.bfloat16).astype(jnp.float32)


if __name__ == "__main__":
    key = jax.random.PRNGKey(0)
    kx, kp = jax.random.split(key)
    w1, b1, w2, b2 = init_params(kp)

    # Small primary run (single grid step, whole-batch block).
    B = 8
    x = jax.random.normal(kx, (B, 28 * 28), dtype=jnp.float32)
    out = jax.block_until_ready(mnist_net_forward(x, w1, b1, w2, b2))
    assert out.shape == (B, 10)
    ref_bf16 = reference_forward_bf16(x, w1, b1, w2, b2)
    ref_f32 = reference_forward_f32(x, w1, b1, w2, b2)
    assert jnp.allclose(out, ref_bf16, atol=5e-2), "mismatch vs bf16-matched reference"
    assert jnp.allclose(out, ref_f32, atol=1e-1), "mismatch vs f32 reference"

    # Exercise the multi-step grid and the Pallas partial-last-block path
    # (B=20 with TB=16 -> 2 grid steps, last block has 4 valid rows).
    B2 = 20
    x2 = jax.random.normal(jax.random.PRNGKey(1), (B2, 28 * 28), dtype=jnp.float32)
    out2 = jax.block_until_ready(mnist_net_forward(x2, w1, b1, w2, b2, tb=16))
    assert out2.shape == (B2, 10)
    ref2_bf16 = reference_forward_bf16(x2, w1, b1, w2, b2)
    ref2_f32 = reference_forward_f32(x2, w1, b1, w2, b2)
    assert jnp.allclose(out2, ref2_bf16, atol=5e-2), "mismatch vs bf16-matched reference (tiled)"
    assert jnp.allclose(out2, ref2_f32, atol=1e-1), "mismatch vs f32 reference (tiled)"

    print("KERNEL_OK")
</pallas_src>

<mosaic_0001>
module attributes {stable_mosaic.version = 11 : i64} {
  func.func @mnist_mlp_kernel(%arg0: i32, %arg1: memref<8x784xbf16, #tpu.memory_space<vmem>>, %arg2: memref<784x128xbf16, #tpu.memory_space<vmem>>, %arg3: memref<1x128xf32, #tpu.memory_space<vmem>>, %arg4: memref<128x128xbf16, #tpu.memory_space<vmem>>, %arg5: memref<1x128xf32, #tpu.memory_space<vmem>>, %arg6: memref<8x128xbf16, #tpu.memory_space<vmem>>) attributes {dimension_semantics = [#tpu.dimension_semantics<parallel>], iteration_bounds = array<i64: 1>, scalar_prefetch = 0 : i64, scratch_operands = 0 : i64, tpu.core_type = #tpu.core_type<tc>, window_params = [{transform_indices = @transform_0, window_bounds = array<i64: 8, 784>}, {pipeline_mode = #tpu.pipeline_mode<synchronous>, transform_indices = @transform_1, window_bounds = array<i64: 784, 128>}, {pipeline_mode = #tpu.pipeline_mode<synchronous>, transform_indices = @transform_2, window_bounds = array<i64: 1, 128>}, {pipeline_mode = #tpu.pipeline_mode<synchronous>, transform_indices = @transform_3, window_bounds = array<i64: 128, 128>}, {pipeline_mode = #tpu.pipeline_mode<synchronous>, transform_indices = @transform_4, window_bounds = array<i64: 1, 128>}, {transform_indices = @transform_5, window_bounds = array<i64: 8, 128>}]} {
    %c0 = arith.constant 0 : index
    %c0_0 = arith.constant 0 : index
    %0 = vector.load %arg1[%c0, %c0_0] : memref<8x784xbf16, #tpu.memory_space<vmem>>, vector<8x784xbf16>
    %c0_1 = arith.constant 0 : index
    %c0_2 = arith.constant 0 : index
    %1 = vector.load %arg2[%c0_1, %c0_2] : memref<784x128xbf16, #tpu.memory_space<vmem>>, vector<784x128xbf16>
    %cst = arith.constant dense<0.000000e+00> : vector<8x128xf32>
    %2 = tpu.matmul %0, %1, %cst {dimension_numbers = #tpu.dot_dimension_numbers<[1], [0], [0], [1], [0, 0, 1, 1], [], []>} : vector<8x784xbf16>, vector<784x128xbf16>, vector<8x128xf32> -> vector<8x128xf32>
    %c0_3 = arith.constant 0 : index
    %c0_4 = arith.constant 0 : index
    %3 = vector.load %arg3[%c0_3, %c0_4] : memref<1x128xf32, #tpu.memory_space<vmem>>, vector<1x128xf32>
    %4 = vector.broadcast %3 : vector<1x128xf32> to vector<8x128xf32>
    %5 = arith.addf %2, %4 : vector<8x128xf32>
    %cst_5 = arith.constant 0.000000e+00 : f32
    %6 = vector.broadcast %cst_5 : f32 to vector<8x128xf32>
    %7 = arith.maximumf %5, %6 : vector<8x128xf32>
    %8 = arith.truncf %7 : vector<8x128xf32> to vector<8x128xbf16>
    %c0_6 = arith.constant 0 : index
    %c0_7 = arith.constant 0 : index
    %9 = vector.load %arg4[%c0_6, %c0_7] : memref<128x128xbf16, #tpu.memory_space<vmem>>, vector<128x128xbf16>
    %cst_8 = arith.constant dense<0.000000e+00> : vector<8x128xf32>
    %10 = tpu.matmul %8, %9, %cst_8 {dimension_numbers = #tpu.dot_dimension_numbers<[1], [0], [0], [1], [0, 0, 1, 1], [], []>} : vector<8x128xbf16>, vector<128x128xbf16>, vector<8x128xf32> -> vector<8x128xf32>
    %c0_9 = arith.constant 0 : index
    %c0_10 = arith.constant 0 : index
    %11 = vector.load %arg5[%c0_9, %c0_10] : memref<1x128xf32, #tpu.memory_space<vmem>>, vector<1x128xf32>
    %12 = vector.broadcast %11 : vector<1x128xf32> to vector<8x128xf32>
    %13 = arith.addf %10, %12 : vector<8x128xf32>
    %cst_11 = arith.constant dense<0xFF800000> : vector<8xf32>
    %14 = vector.multi_reduction <maximumf>, %13, %cst_11 [1] : vector<8x128xf32> to vector<8xf32>
    %15 = vector.shape_cast %14 : vector<8xf32> to vector<8x1xf32>
    %16 = vector.broadcast %15 : vector<8x1xf32> to vector<8x128xf32>
    %17 = arith.subf %13, %16 : vector<8x128xf32>
    %18 = math.exp %17 : vector<8x128xf32>
    %cst_12 = arith.constant dense<0.000000e+00> : vector<8xf32>
    %19 = vector.multi_reduction <add>, %18, %cst_12 [1] : vector<8x128xf32> to vector<8xf32>
    %20 = vector.shape_cast %19 : vector<8xf32> to vector<8x1xf32>
    %21 = math.log %20 : vector<8x1xf32>
    %22 = vector.broadcast %21 : vector<8x1xf32> to vector<8x128xf32>
    %23 = arith.subf %17, %22 : vector<8x128xf32>
    %24 = arith.truncf %23 : vector<8x128xf32> to vector<8x128xbf16>
    %c0_13 = arith.constant 0 : index
    %c0_14 = arith.constant 0 : index
    %25 = vector.load %arg6[%c0_13, %c0_14] : memref<8x128xbf16, #tpu.memory_space<vmem>>, vector<8x128xbf16>
    tpu.vector_store %arg6[%c0_13, %c0_14], %24 {strides = array<i32>} : memref<8x128xbf16, #tpu.memory_space<vmem>>, vector<8x128xbf16>,
    return
  }
  func.func @transform_0(%arg0: i32) -> (i32, i32) {
    %c0_i32 = arith.constant 0 : i32
    %c0_i32_0 = arith.constant 0 : i32
    return %arg0, %c0_i32 : i32, i32
  }
  func.func @transform_1(%arg0: i32) -> (i32, i32) {
    %c0_i32 = arith.constant 0 : i32
    %c0_i32_0 = arith.constant 0 : i32
    %c0_i32_1 = arith.constant 0 : i32
    return %c0_i32, %c0_i32_0 : i32, i32
  }
  func.func @transform_2(%arg0: i32) -> (i32, i32) {
    %c0_i32 = arith.constant 0 : i32
    %c0_i32_0 = arith.constant 0 : i32
    %c0_i32_1 = arith.constant 0 : i32
    return %c0_i32, %c0_i32_0 : i32, i32
  }
  func.func @transform_3(%arg0: i32) -> (i32, i32) {
    %c0_i32 = arith.constant 0 : i32
    %c0_i32_0 = arith.constant 0 : i32
    %c0_i32_1 = arith.constant 0 : i32
    return %c0_i32, %c0_i32_0 : i32, i32
  }
  func.func @transform_4(%arg0: i32) -> (i32, i32) {
    %c0_i32 = arith.constant 0 : i32
    %c0_i32_0 = arith.constant 0 : i32
    %c0_i32_1 = arith.constant 0 : i32
    return %c0_i32, %c0_i32_0 : i32, i32
  }
  func.func @transform_5(%arg0: i32) -> (i32, i32) {
    %c0_i32 = arith.constant 0 : i32
    %c0_i32_0 = arith.constant 0 : i32
    return %arg0, %c0_i32 : i32, i32
  }
}

</mosaic_0001>

<bundles_post_ra>
// kernel: _mnist_forward_impl.1
= control target key start
LH: loop header
LB: loop body
LE: loop exit
PB: predicated region body
PF: predicated region fallthrough
CT: control target
= control target key end

     0   :  { %vm445_vm0 = vcmask 130048   ;;  %s1153_s1 = inlined_call_operand.vmem [shape: bf16[784,128], index: 1, kind: input, shape index: {}]   ;;  %s1154_s2 = inlined_call_operand.vmem [shape: f32[1,128], index: 2, kind: input, shape index: {}]   ;;  %s1155_s0 = inlined_call_operand.vmem [shape: bf16[8,784], index: 0, kind: input, shape index: {}]   ;;  %s1156_s4 = inlined_call_operand.vmem [shape: f32[1,128], index: 4, kind: input, shape index: {}]   ;;  %s1157_s3 = inlined_call_operand.vmem [shape: bf16[128,128], index: 3, kind: input, shape index: {}]   ;;  %s1158_s5 = inlined_call_operand.vmem [shape: bf16[8,128], index: 5, kind: output, shape index: {}]  }
   0x1   :  { %v875_v0 = vld [vmem:[%s1153_s1 + $0x38] sm:$0xff]  ;;  %v874_v3 = vld [vmem:[%s1153_s1 + $0x30] sm:$0xff]  ;;  %v873_v8 = vld [vmem:[%s1153_s1 + $0x28] sm:$0xff] }
   0x2   :  { %v883_v1 = vld [vmem:[%s1153_s1 + $0x78] sm:$0xff]  ;;  %449 = vmatpush.bf16.msra.mxu0 %v875_v0  ;;  %v882_v4 = vld [vmem:[%s1153_s1 + $0x70] sm:$0xff]  ;;  %v881_v9 = vld [vmem:[%s1153_s1 + $0x68] sm:$0xff] }
   0x3   :  { %v891_v2 = vld [vmem:[%s1153_s1 + $0xb8] sm:$0xff]  ;;  %462 = vmatpush.bf16.msra.mxu1 %v883_v1  ;;  %v890_v5 = vld [vmem:[%s1153_s1 + $0xb0] sm:$0xff]  ;;  %v889_v10 = vld [vmem:[%s1153_s1 + $0xa8] sm:$0xff] }
   0x4   :  { %475 = vmatpush.bf16.msra.mxu2 %v891_v2  ;;  %v899_v6 = vld [vmem:[%s1153_s1 + $0xf8] sm:$0xff]  ;;  %v898_v7 = vld [vmem:[%s1153_s1 + $0xf0] sm:$0xff]  ;;  %v897_v11 = vld [vmem:[%s1153_s1 + $0xe8] sm:$0xff] }
   0x5   :  { %488 = vmatpush.bf16.msra.mxu3 %v899_v6  ;;  %v872_v12 = vld [vmem:[%s1153_s1 + $0x20] sm:$0xff]  ;;  %v871_v16 = vld [vmem:[%s1153_s1 + $0x18] sm:$0xff]  ;;  %v870_v20 = vld [vmem:[%s1153_s1 + $0x10] sm:$0xff] }
   0x6   :  { %450 = vmatpush.bf16.msra.mxu0 %v874_v3  ;;  %v880_v13 = vld [vmem:[%s1153_s1 + $0x60] sm:$0xff]  ;;  %v879_v17 = vld [vmem:[%s1153_s1 + $0x58] sm:$0xff]  ;;  %v878_v21 = vld [vmem:[%s1153_s1 + $0x50] sm:$0xff] }
   0x7   :  { %463 = vmatpush.bf16.msra.mxu1 %v882_v4  ;;  %v888_v14 = vld [vmem:[%s1153_s1 + $0xa0] sm:$0xff]  ;;  %v887_v18 = vld [vmem:[%s1153_s1 + $0x98] sm:$0xff]  ;;  %v886_v22 = vld [vmem:[%s1153_s1 + $0x90] sm:$0xff] }
   0x8   :  { %476 = vmatpush.bf16.msra.mxu2 %v890_v5  ;;  %v896_v15 = vld [vmem:[%s1153_s1 + $0xe0] sm:$0xff]  ;;  %v895_v19 = vld [vmem:[%s1153_s1 + $0xd8] sm:$0xff]  ;;  %v894_v23 = vld [vmem:[%s1153_s1 + $0xd0] sm:$0xff] }
   0x9   :  { %489 = vmatpush.bf16.msra.mxu3 %v898_v7  ;;  %v869_v24 = vld [vmem:[%s1153_s1 + $0x8] sm:$0xff]  ;;  %v21_v26 = vld [vmem:[%s1155_s0] sm:$0xff]  ;;  %v907_v34 = vld [vmem:[%s1153_s1 + $0x138] sm:$0xff] }
   0xa   :  { %451 = vmatpush.bf16.msra.mxu0 %v873_v8  ;;  %v877_v25 = vld [vmem:[%s1153_s1 + $0x48] sm:$0xff]  ;;  %v131_v29 = vunpack.c.l.b16 %v21_v26  ;;  %v132_v31 = vunpack.c.h.b16 %v21_v26  ;;  %v868_v32 = vld [vmem:[%s1153_s1] sm:$0xff]  ;;  %v915_v35 = vld [vmem:[%s1153_s1 + $0x178] sm:$0xff] }
   0xb   :  { %464 = vmatpush.bf16.msra.mxu1 %v881_v9  ;;  %v885_v27 = vld [vmem:[%s1153_s1 + $0x88] sm:$0xff]  ;;  %v876_v33 = vld [vmem:[%s1153_s1 + $0x40] sm:$0xff]  ;;  %v906_v43 = vld [vmem:[%s1153_s1 + $0x130] sm:$0xff] }
   0xc   :  { %477 = vmatpush.bf16.msra.mxu2 %v889_v10  ;;  %v22_v28 = vld [vmem:[%s1155_s0 + $0x8] sm:$0xff]  ;;  %v884_v36 = vld [vmem:[%s1153_s1 + $0x80] sm:$0xff]  ;;  %v138_v38 = vpack.c.b16 %v131_v29, %v131_v29  ;;  %v139_v39 = vpack.c.b16 %v132_v31, %v132_v31  ;;  %v914_v44 = vld [vmem:[%s1153_s1 + $0x170] sm:$0xff] }
   0xd   :  { %490 = vmatpush.bf16.msra.mxu3 %v897_v11  ;;  %v893_v30 = vld [vmem:[%s1153_s1 + $0xc8] sm:$0xff]  ;;  %v133_v37 = vunpack.c.l.b16 %v22_v28  ;;  %v134_v40 = vunpack.c.h.b16 %v22_v28  ;;  %v892_v41 = vld [vmem:[%s1153_s1 + $0xc0] sm:$0xff]  ;;  %v24_v51 = vld [vmem:[%s1155_s0 + $0x18] sm:$0xf] }
   0xe   :  { %452 = vmatpush.bf16.msra.mxu0 %v872_v12  ;;  %v916_v42 = vld [vmem:[%s1153_s1 + $0x180] sm:$0xff]  ;;  %v905_v47 = vld [vmem:[%s1153_s1 + $0x128] sm:$0xff]  ;;  %v903_v52 = vld [vmem:[%s1153_s1 + $0x118] sm:$0xff]  ;;  %v137_v54 = vunpack.c.l.b16 %v24_v51 }
   0xf   :  { %465 = vmatpush.bf16.msra.mxu1 %v880_v13  ;;  %v140_v45 = vpack.c.b16 %v133_v37, %v133_v37  ;;  %v141_v46 = vpack.c.b16 %v134_v40, %v134_v40  ;;  %v913_v48 = vld [vmem:[%s1153_s1 + $0x168] sm:$0xff]  ;;  %v904_v49 = vld [vmem:[%s1153_s1 + $0x120] sm:$0xff]  ;;  %v911_v53 = vld [vmem:[%s1153_s1 + $0x158] sm:$0xff] }
  0x10   :  { %478 = vmatpush.bf16.msra.mxu2 %v888_v14  ;;  %v912_v50 = vld [vmem:[%s1153_s1 + $0x160] sm:$0xff]  ;;  %v902_v55 = vld [vmem:[%s1153_s1 + $0x110] sm:$0xff]  ;;  %v144_v57 = vpack.c.b16 %v137_v54, %v137_v54  ;;  %v901_v58 = vld [vmem:[%s1153_s1 + $0x108] sm:$0xff] }
  0x11   :  { %491 = vmatpush.bf16.msra.mxu3 %v896_v15  ;;  %v910_v56 = vld [vmem:[%s1153_s1 + $0x150] sm:$0xff]  ;;  %v909_v59 = vld [vmem:[%s1153_s1 + $0x148] sm:$0xff]  ;;  %v900_v63 = vld [vmem:[%s1153_s1 + $0x100] sm:$0xff] }
  0x12   :  { %453 = vmatpush.bf16.msra.mxu0 %v871_v16  ;;  %v23_v60 = vld [vmem:[%s1155_s0 + $0x10] sm:$0xff]  ;;  %v908_v0 = vld [vmem:[%s1153_s1 + $0x140] sm:$0xff]  ;;  %v924_v3 = vld [vmem:[%s1157_s3 + $0x38] sm:$0xff] }
  0x13   :  { %466 = vmatpush.bf16.msra.mxu1 %v879_v17  ;;  %v135_v61 = vunpack.c.l.b16 %v23_v60  ;;  %v136_v62 = vunpack.c.h.b16 %v23_v60  ;;  %v923_v4 = vld [vmem:[%s1157_s3 + $0x30] sm:$0xff]  ;;  %v922_v5 = vld [vmem:[%s1157_s3 + $0x28] sm:$0xff]  ;;  %v921_v6 = vld [vmem:[%s1157_s3 + $0x20] sm:$0xff] }
  0x14   :  { %479 = vmatpush.bf16.msra.mxu2 %v887_v18  ;;  %v920_v7 = vld [vmem:[%s1157_s3 + $0x18] sm:$0xff]  ;;  %v919_v8 = vld [vmem:[%s1157_s3 + $0x10] sm:$0xff]  ;;  %v918_v9 = vld [vmem:[%s1157_s3 + $0x8] sm:$0xff] }
  0x15   :  { %492 = vmatpush.bf16.msra.mxu3 %v895_v19  ;;  %v142_v1 = vpack.c.b16 %v135_v61, %v135_v61  ;;  %v143_v2 = vpack.c.b16 %v136_v62, %v136_v62  ;;  %v917_v12 = vld [vmem:[%s1157_s3] sm:$0xff] }
  0x16   :  { %454 = vmatpush.bf16.msra.mxu0 %v870_v20  ;;  %v925_v17 = vld [vmem:[%s1154_s2] ss:$0 sm:$0xff] }
  0x17   :  { %467 = vmatpush.bf16.msra.mxu1 %v878_v21 }
  0x18   :  { %480 = vmatpush.bf16.msra.mxu2 %v886_v22 }
  0x19   :  { %493 = vmatpush.bf16.msra.mxu3 %v894_v23 }
  0x1a   :  { %455 = vmatpush.bf16.msra.mxu0 %v869_v24 }
  0x1b   :  { %468 = vmatpush.bf16.msra.mxu1 %v877_v25 }
  0x1c   :  { %481 = vmatpush.bf16.msra.mxu2 %v885_v27 }
  0x1d   :  { %494 = vmatpush.bf16.msra.mxu3 %v893_v30 }
  0x1e   :  { %456 = vmatpush.bf16.msra.mxu0 %v868_v32 }
  0x1f   :  { %469 = vmatpush.bf16.msra.mxu1 %v876_v33 }
  0x20   :  { %482 = vmatpush.bf16.msra.mxu2 %v884_v36 }
  0x21   :  { %457 = vmatmul.bf16.vlgmr.msra.gmra.mxu0 %v138_v38  ;;  %495 = vmatpush.bf16.msra.mxu3 %v892_v41 }
  0x22   :  { %501 = vmatpush.bf16.msrb.mxu0 %v907_v34  ;;  %470 = vmatmul.bf16.vlgmr.msra.gmra.mxu1 %v139_v39 }
  0x23   :  { %514 = vmatpush.bf16.msrb.mxu1 %v915_v35  ;;  %483 = vmatmul.bf16.vlgmr.msra.gmra.mxu2 %v140_v45  ;;  %v926_v35 = vld [vmem:[%s1156_s4] ss:$0 sm:$0xff] }
  0x24   :  { %534 = vmatpush.bf16.msrb.mxu2 %v916_v42  ;;  %496 = vmatmul.bf16.vlgmr.msra.gmra.mxu3 %v141_v46 }
  0x25   :  { %610 = vmatpush.bf16.msrb.mxu3 %v924_v3 }
  0x26   :  { %502 = vmatpush.bf16.msrb.mxu0 %v906_v43 }
  0x27   :  { %515 = vmatpush.bf16.msrb.mxu1 %v914_v44 }
  0x29   :  { %611 = vmatpush.bf16.msrb.mxu3 %v923_v4 }
  0x2a   :  { %503 = vmatpush.bf16.msrb.mxu0 %v905_v47 }
  0x2b   :  { %516 = vmatpush.bf16.msrb.mxu1 %v913_v48 }
  0x2d   :  { %612 = vmatpush.bf16.msrb.mxu3 %v922_v5 }
  0x2e   :  { %504 = vmatpush.bf16.msrb.mxu0 %v904_v49 }
  0x2f   :  { %517 = vmatpush.bf16.msrb.mxu1 %v912_v50 }
  0x31   :  { %613 = vmatpush.bf16.msrb.mxu3 %v921_v6 }
  0x32   :  { %505 = vmatpush.bf16.msrb.mxu0 %v903_v52 }
  0x33   :  { %518 = vmatpush.bf16.msrb.mxu1 %v911_v53  ;;  %835 = vmatmul.msk.bf16.vlgmr.msrb.gmra.mxu2 %vm445_vm0, %v144_v57 }
  0x35   :  { %614 = vmatpush.bf16.msrb.mxu3 %v920_v7 }
  0x36   :  { %506 = vmatpush.bf16.msrb.mxu0 %v902_v55 }
  0x37   :  { %519 = vmatpush.bf16.msrb.mxu1 %v910_v56 }
  0x39   :  { %615 = vmatpush.bf16.msrb.mxu3 %v919_v8 }
  0x3a   :  { %507 = vmatpush.bf16.msrb.mxu0 %v901_v58 }
  0x3b   :  { %520 = vmatpush.bf16.msrb.mxu1 %v909_v59 }
  0x3d   :  { %616 = vmatpush.bf16.msrb.mxu3 %v918_v9 }
  0x3e   :  { %508 = vmatpush.bf16.msrb.mxu0 %v900_v63 }
  0x3f   :  { %521 = vmatpush.bf16.msrb.mxu1 %v908_v0 }
  0x41   :  { %509 = vmatmul.bf16.vlgmr.msrb.gmra.mxu0 %v142_v1  ;;  %617 = vmatpush.bf16.msrb.mxu3 %v917_v12 }
  0x42   :  { %522 = vmatmul.bf16.vlgmr.msrb.gmra.mxu1 %v143_v2 }
  0x9e   :  { %v458_v10 = vpop.f32.mrf.mxu0 }
  0x9f   :  { %v471_v11 = vpop.f32.mrf.mxu1  ;;  %v459_v18 = vadd.f32 %v925_v17, %v458_v10 }
  0xa1   :  { %v472_v21 = vadd.f32 %v471_v11, %v459_v18 }
  0xa6   :  { %v460_v13 = vpop.f32.mrf.mxu0  ;;  %v484_v15 = vpop.f32.mrf.mxu2 }
  0xa7   :  { %v473_v14 = vpop.f32.mrf.mxu1  ;;  %v497_v16 = vpop.f32.mrf.mxu3  ;;  %v485_v22 = vadd.f32 %v484_v15, %v472_v21 }
  0xa9   :  { %v498_v24 = vadd.f32 %v497_v16, %v485_v22 }
  0xae   :  { %v486_v19 = vpop.f32.mrf.mxu2 }
  0xaf   :  { %v499_v20 = vpop.f32.mrf.mxu3 }
  0xb6   :  { %v536_v23 = vpop.f32.mrf.mxu2 }
  0xbe   :  { %v510_v25 = vpop.f32.mrf.mxu0  ;;  %v538_v29 = vpop.f32.mrf.mxu2 }
  0xbf   :  { %v523_v26 = vpop.f32.mrf.mxu1  ;;  %v511_v27 = vadd.f32 %v510_v25, %v498_v24 }
  0xc1   :  { %v524_v28 = vadd.f32 %v523_v26, %v511_v27 }
  0xc3   :  { %v537_v30 = vadd.f32 %v536_v23, %v524_v28 }
  0xc5   :  { %v540_v31 = vmax.f32 %v537_v30, 0.0 }
  0xc6   :  { %v512_v32 = vpop.f32.mrf.mxu0 }
  0xc7   :  { %v525_v33 = vpop.f32.mrf.mxu1  ;;  %v541_v34 = vpack.c.bf16 %v540_v31, %v540_v31 }
  0xc9   :  { %618 = vmatmul.bf16.vlgmr.msrb.gmra.mxu3 %v541_v34 }
 0x14c   :  { %v619_v36 = vpop.f32.mrf.mxu3 }
 0x14d   :  { %v620_v37 = vadd.f32 %v926_v35, %v619_v36 }
 0x14f   :  { %623 = vmax.xlane.f32.xlu0 %v620_v37 }
 0x154   :  { %v621_v38 = vpop.f32.mrf.mxu3 }
 0x1c2   :  { %v624_v39 = vpop.xlane.xlu0 %623 }
 0x1c3   :  { %v625_v40 = vsub.f32 %v620_v37, %v624_v39 }
 0x1c5   :  { %v626_v41 = vmul.f32 1.442695, %v625_v40 }
 0x1c7   :  { %927 = vpow2.f32 %v626_v41 }
 0x1cd   :  { %v928_v42 = vpop.eup %927 }
 0x1ce   :  { %628 = vadd.xlane.f32.xlu0 %v928_v42 }
 0x241   :  { %v629_v43 = vpop.xlane.xlu0 %628 }
 0x242   :  { %929 = vlog2.f32 %v629_v43 }
 0x248   :  { %v930_v44 = vpop.eup %929 }
 0x249   :  { %v631_v45 = vmul.f32 0.6931472, %v930_v44 }
 0x24b   :  { %v632_v46 = vsub.f32 %v625_v40, %v631_v45 }
 0x24d   :  { %v633_v47 = vpack.c.bf16 %v632_v46, %v632_v46 }
 0x24f   :  { %634 = vst [vmem:[%s1158_s5] sm:$0xf] %v633_v47 }

</bundles_post_ra>
